<compile_context>
chip_gen: v7x
topology: tpu7x:2x2x1
jax: 0.10.0
libtpu: 0.0.40
codegen_flags: <defaults>
</compile_context>

<pallas_src>
import jax
import jax.numpy as jnp
from jax.experimental import pallas as pl
from jax.experimental.pallas import tpu as pltpu


def attention_gate_kernel(x_ref, g_ref, wg_ref, wx_ref, b_ref, wpsi_ref,
                          bpsi_ref, out_ref):
    # x_ref:   (1, C_in, S)   g_ref: (1, C_g, S)      (channels on sublanes, spatial on lanes)
    # wg_ref:  (C_in, C_g)    wx_ref: (C_in, C_in)    (PyTorch (out, in) orientation)
    # b_ref:   (C_in, 1)  = bg + bx (fused)
    # wpsi_ref:(C_in, 1)      bpsi_ref: (1,) in SMEM
    x = x_ref[0]                       # (C_in, S)
    g = g_ref[0]                       # (C_g, S)

    # Fused 1x1 convs: relu(Wg @ g + Wx @ x + (bg + bx)), f32 accumulation.
    a = (jnp.dot(wg_ref[...], g, preferred_element_type=jnp.float32)
         + jnp.dot(wx_ref[...], x, preferred_element_type=jnp.float32)
         + b_ref[...])
    a = jnp.maximum(a, 0.0)            # ReLU (VPU)

    # psi projection: width-1 matmul replaced by VPU multiply + sublane reduce.
    logits = jnp.sum(wpsi_ref[...] * a, axis=0, keepdims=True) + bpsi_ref[0]
    psi = jax.nn.sigmoid(logits)       # (1, S), EUP

    # Gate: broadcast psi over channel sublanes; lane-dense store.
    out_ref[0] = (x.astype(jnp.float32) * psi).astype(out_ref.dtype)


def attention_gate(x_nchw, g_nchw, params, *, max_spatial_tile=2048,
                   vmem_limit_bytes=48 * 1024 * 1024):
    """x_nchw: (N, C_in, H, W)   g_nchw: (N, C_g, H, W)  -> (N, C_in, H, W)"""
    wg, bg, wx, bx, wpsi, bpsi = params
    N, C_in, H, W = x_nchw.shape
    _, C_g, _, _ = g_nchw.shape
    HW = H * W

    # Free views of NCHW memory: no transposes, no copies.
    x3 = x_nchw.reshape(N, C_in, HW)
    g3 = g_nchw.reshape(N, C_g, HW)

    # Lane-dense spatial tile: full extent if it fits, otherwise a large
    # multiple of 128 (Pallas masks the ragged last block's stores).
    if HW <= max_spatial_tile:
        tile_s = HW
    else:
        tile_s = max(128, (max_spatial_tile // 128) * 128)
    grid = (N, pl.cdiv(HW, tile_s))

    # Fused bias (bg + bx), psi weight as a (C_in, 1) column, b_psi as SMEM scalar.
    b_fused = (bg + bx).astype(jnp.float32).reshape(C_in, 1)
    wpsi_col = wpsi.astype(jnp.float32).reshape(C_in, 1)
    bpsi_s = bpsi.astype(jnp.float32).reshape(1)

    out3 = pl.pallas_call(
        attention_gate_kernel,
        out_shape=jax.ShapeDtypeStruct((N, C_in, HW), x_nchw.dtype),
        grid_spec=pltpu.PrefetchScalarGridSpec(
            num_scalar_prefetch=0,
            grid=grid,
            in_specs=[
                pl.BlockSpec((1, C_in, tile_s), lambda n, s: (n, 0, s)),   # x tile
                pl.BlockSpec((1, C_g, tile_s), lambda n, s: (n, 0, s)),    # g tile
                pl.BlockSpec((C_in, C_g), lambda n, s: (0, 0)),            # W_g (out,in)
                pl.BlockSpec((C_in, C_in), lambda n, s: (0, 0)),           # W_x (out,in)
                pl.BlockSpec((C_in, 1), lambda n, s: (0, 0)),              # bg + bx
                pl.BlockSpec((C_in, 1), lambda n, s: (0, 0)),              # w_psi column
                pl.BlockSpec(memory_space=pltpu.MemorySpace.SMEM),         # b_psi scalar
            ],
            out_specs=pl.BlockSpec((1, C_in, tile_s), lambda n, s: (n, 0, s)),
        ),
        compiler_params=pltpu.CompilerParams(
            dimension_semantics=("parallel", "parallel"),
            vmem_limit_bytes=vmem_limit_bytes,
        ),
    )(x3, g3, wg, wx, b_fused, wpsi_col, bpsi_s)

    return out3.reshape(N, C_in, H, W)


def init_params(key, in_channels, gating_channels):
    """Deterministic synthetic init. Conv weights kept in PyTorch (out, in) orientation."""
    k = jax.random.split(key, 6)
    wg = jax.random.normal(k[0], (in_channels, gating_channels), jnp.float32) * 0.2
    bg = jax.random.normal(k[1], (in_channels,), jnp.float32) * 0.1
    wx = jax.random.normal(k[2], (in_channels, in_channels), jnp.float32) * 0.2
    bx = jax.random.normal(k[3], (in_channels,), jnp.float32) * 0.1
    wpsi = jax.random.normal(k[4], (in_channels,), jnp.float32) * 0.2
    bpsi = jax.random.normal(k[5], (1,), jnp.float32) * 0.1
    return (wg, bg, wx, bx, wpsi, bpsi)


def attention_gate_ref(x_nchw, g_nchw, params):
    """Pure-JAX reference (same math as the PyTorch module)."""
    wg, bg, wx, bx, wpsi, bpsi = params
    g_conv = jnp.einsum("nchw,dc->ndhw", g_nchw, wg) + bg[None, :, None, None]
    x_conv = jnp.einsum("nchw,dc->ndhw", x_nchw, wx) + bx[None, :, None, None]
    a = jnp.maximum(g_conv + x_conv, 0.0)
    logits = jnp.einsum("nchw,c->nhw", a, wpsi)[:, None, :, :] + bpsi.reshape(1, 1, 1, 1)
    psi = jax.nn.sigmoid(logits)
    return x_nchw * psi


if __name__ == "__main__":
    key = jax.random.PRNGKey(0)
    k_x, k_g, k_p = jax.random.split(key, 3)

    N, C_in, C_g, H, W = 2, 4, 8, 16, 16
    x = jax.random.normal(k_x, (N, C_in, H, W), jnp.float32)
    g = jax.random.normal(k_g, (N, C_g, H, W), jnp.float32)
    params = init_params(k_p, C_in, C_g)

    out = attention_gate(x, g, params)
    out = jax.block_until_ready(out)

    ref = attention_gate_ref(x, g, params)
    assert out.shape == (N, C_in, H, W)
    assert jnp.allclose(out, ref, atol=1e-5, rtol=1e-5), "mismatch vs reference"

    print("KERNEL_OK")
</pallas_src>

<mosaic_0001>
module attributes {stable_mosaic.version = 11 : i64} {
  func.func @attention_gate_kernel(%arg0: i32, %arg1: i32, %arg2: memref<1x4x256xf32, #tpu.memory_space<vmem>>, %arg3: memref<1x8x256xf32, #tpu.memory_space<vmem>>, %arg4: memref<4x8xf32, #tpu.memory_space<vmem>>, %arg5: memref<4x4xf32, #tpu.memory_space<vmem>>, %arg6: memref<4x1xf32, #tpu.memory_space<vmem>>, %arg7: memref<4x1xf32, #tpu.memory_space<vmem>>, %arg8: memref<1xf32, #tpu.memory_space<smem>>, %arg9: memref<1x4x256xf32, #tpu.memory_space<vmem>>) attributes {dimension_semantics = [#tpu.dimension_semantics<parallel>, #tpu.dimension_semantics<parallel>], iteration_bounds = array<i64: 2, 1>, scalar_prefetch = 0 : i64, scratch_operands = 0 : i64, tpu.core_type = #tpu.core_type<tc>, window_params = [{transform_indices = @transform_0, window_bounds = array<i64: 1, 4, 256>}, {transform_indices = @transform_1, window_bounds = array<i64: 1, 8, 256>}, {pipeline_mode = #tpu.pipeline_mode<synchronous>, transform_indices = @transform_2, window_bounds = array<i64: 4, 8>}, {pipeline_mode = #tpu.pipeline_mode<synchronous>, transform_indices = @transform_3, window_bounds = array<i64: 4, 4>}, {pipeline_mode = #tpu.pipeline_mode<synchronous>, transform_indices = @transform_4, window_bounds = array<i64: 4, 1>}, {pipeline_mode = #tpu.pipeline_mode<synchronous>, transform_indices = @transform_5, window_bounds = array<i64: 4, 1>}, {transform_indices = @transform_6, window_bounds = array<i64: 1>}, {transform_indices = @transform_7, window_bounds = array<i64: 1, 4, 256>}]} {
    %c0 = arith.constant 0 : index
    %c0_0 = arith.constant 0 : index
    %c0_1 = arith.constant 0 : index
    %0 = vector.load %arg2[%c0, %c0_0, %c0_1] : memref<1x4x256xf32, #tpu.memory_space<vmem>>, vector<1x4x256xf32>
    %1 = vector.shape_cast %0 : vector<1x4x256xf32> to vector<4x256xf32>
    %c0_2 = arith.constant 0 : index
    %c0_3 = arith.constant 0 : index
    %c0_4 = arith.constant 0 : index
    %2 = vector.load %arg3[%c0_2, %c0_3, %c0_4] : memref<1x8x256xf32, #tpu.memory_space<vmem>>, vector<1x8x256xf32>
    %3 = vector.shape_cast %2 : vector<1x8x256xf32> to vector<8x256xf32>
    %c0_5 = arith.constant 0 : index
    %c0_6 = arith.constant 0 : index
    %4 = vector.load %arg4[%c0_5, %c0_6] : memref<4x8xf32, #tpu.memory_space<vmem>>, vector<4x8xf32>
    %cst = arith.constant dense<0.000000e+00> : vector<4x256xf32>
    %5 = tpu.matmul %4, %3, %cst {dimension_numbers = #tpu.dot_dimension_numbers<[1], [0], [0], [1], [0, 0, 1, 1], [], []>} : vector<4x8xf32>, vector<8x256xf32>, vector<4x256xf32> -> vector<4x256xf32>
    %c0_7 = arith.constant 0 : index
    %c0_8 = arith.constant 0 : index
    %6 = vector.load %arg5[%c0_7, %c0_8] : memref<4x4xf32, #tpu.memory_space<vmem>>, vector<4x4xf32>
    %cst_9 = arith.constant dense<0.000000e+00> : vector<4x256xf32>
    %7 = tpu.matmul %6, %1, %cst_9 {dimension_numbers = #tpu.dot_dimension_numbers<[1], [0], [0], [1], [0, 0, 1, 1], [], []>} : vector<4x4xf32>, vector<4x256xf32>, vector<4x256xf32> -> vector<4x256xf32>
    %8 = arith.addf %5, %7 : vector<4x256xf32>
    %c0_10 = arith.constant 0 : index
    %c0_11 = arith.constant 0 : index
    %9 = vector.load %arg6[%c0_10, %c0_11] : memref<4x1xf32, #tpu.memory_space<vmem>>, vector<4x1xf32>
    %10 = vector.broadcast %9 : vector<4x1xf32> to vector<4x256xf32>
    %11 = arith.addf %8, %10 : vector<4x256xf32>
    %cst_12 = arith.constant 0.000000e+00 : f32
    %12 = vector.broadcast %cst_12 : f32 to vector<4x256xf32>
    %13 = arith.maximumf %11, %12 : vector<4x256xf32>
    %c0_13 = arith.constant 0 : index
    %c0_14 = arith.constant 0 : index
    %14 = vector.load %arg7[%c0_13, %c0_14] : memref<4x1xf32, #tpu.memory_space<vmem>>, vector<4x1xf32>
    %15 = vector.broadcast %14 : vector<4x1xf32> to vector<4x256xf32>
    %16 = arith.mulf %15, %13 : vector<4x256xf32>
    %cst_15 = arith.constant dense<0.000000e+00> : vector<256xf32>
    %17 = vector.multi_reduction <add>, %16, %cst_15 [0] : vector<4x256xf32> to vector<256xf32>
    %18 = vector.shape_cast %17 : vector<256xf32> to vector<1x256xf32>
    %c0_16 = arith.constant 0 : index
    %19 = memref.load %arg8[%c0_16] : memref<1xf32, #tpu.memory_space<smem>>
    %20 = vector.broadcast %19 : f32 to vector<1x256xf32>
    %21 = arith.addf %18, %20 : vector<1x256xf32>
    %22 = arith.negf %21 : vector<1x256xf32>
    %23 = math.exp %22 : vector<1x256xf32>
    %cst_17 = arith.constant 1.000000e+00 : f32
    %24 = vector.broadcast %cst_17 : f32 to vector<1x256xf32>
    %25 = arith.addf %24, %23 : vector<1x256xf32>
    %26 = arith.divf %24, %25 : vector<1x256xf32>
    %27 = vector.broadcast %26 : vector<1x256xf32> to vector<4x256xf32>
    %28 = arith.mulf %1, %27 : vector<4x256xf32>
    %c0_18 = arith.constant 0 : index
    %c0_19 = arith.constant 0 : index
    %c0_20 = arith.constant 0 : index
    %29 = vector.load %arg9[%c0_18, %c0_19, %c0_20] : memref<1x4x256xf32, #tpu.memory_space<vmem>>, vector<1x4x256xf32>
    %30 = vector.shape_cast %29 : vector<1x4x256xf32> to vector<4x256xf32>
    %31 = vector.shape_cast %28 : vector<4x256xf32> to vector<1x4x256xf32>
    tpu.vector_store %arg9[%c0_18, %c0_19, %c0_20], %31 {strides = array<i32>} : memref<1x4x256xf32, #tpu.memory_space<vmem>>, vector<1x4x256xf32>,
    return
  }
  func.func @transform_0(%arg0: i32, %arg1: i32) -> (i32, i32, i32) {
    %c0_i32 = arith.constant 0 : i32
    %c0_i32_0 = arith.constant 0 : i32
    return %arg0, %c0_i32, %arg1 : i32, i32, i32
  }
  func.func @transform_1(%arg0: i32, %arg1: i32) -> (i32, i32, i32) {
    %c0_i32 = arith.constant 0 : i32
    %c0_i32_0 = arith.constant 0 : i32
    return %arg0, %c0_i32, %arg1 : i32, i32, i32
  }
  func.func @transform_2(%arg0: i32, %arg1: i32) -> (i32, i32) {
    %c0_i32 = arith.constant 0 : i32
    %c0_i32_0 = arith.constant 0 : i32
    %c0_i32_1 = arith.constant 0 : i32
    return %c0_i32, %c0_i32_0 : i32, i32
  }
  func.func @transform_3(%arg0: i32, %arg1: i32) -> (i32, i32) {
    %c0_i32 = arith.constant 0 : i32
    %c0_i32_0 = arith.constant 0 : i32
    %c0_i32_1 = arith.constant 0 : i32
    return %c0_i32, %c0_i32_0 : i32, i32
  }
  func.func @transform_4(%arg0: i32, %arg1: i32) -> (i32, i32) {
    %c0_i32 = arith.constant 0 : i32
    %c0_i32_0 = arith.constant 0 : i32
    %c0_i32_1 = arith.constant 0 : i32
    return %c0_i32, %c0_i32_0 : i32, i32
  }
  func.func @transform_5(%arg0: i32, %arg1: i32) -> (i32, i32) {
    %c0_i32 = arith.constant 0 : i32
    %c0_i32_0 = arith.constant 0 : i32
    %c0_i32_1 = arith.constant 0 : i32
    return %c0_i32, %c0_i32_0 : i32, i32
  }
  func.func @transform_6(%arg0: i32, %arg1: i32) -> i32 {
    %c0_i32 = arith.constant 0 : i32
    %c0_i32_0 = arith.constant 0 : i32
    return %c0_i32 : i32
  }
  func.func @transform_7(%arg0: i32, %arg1: i32) -> (i32, i32, i32) {
    %c0_i32 = arith.constant 0 : i32
    %c0_i32_0 = arith.constant 0 : i32
    return %arg0, %c0_i32, %arg1 : i32, i32, i32
  }
}

</mosaic_0001>

<bundles_post_ra>
// kernel: tpu_custom_call.1
= control target key start
LH: loop header
LB: loop body
LE: loop exit
PB: predicated region body
PF: predicated region fallthrough
CT: control target
= control target key end

     0   :  { %s1248_s0 = inlined_call_operand.hbm [shape: f32[2,4,256], index: 0, kind: input, shape index: {}]   ;;  %s1249_s1 = inlined_call_operand.hbm [shape: f32[2,8,256], index: 1, kind: input, shape index: {}]   ;;  %s1250_s2 = inlined_call_operand.vmem [shape: f32[4,8], index: 2, kind: input, shape index: {}]   ;;  %s1251_s3 = inlined_call_operand.vmem [shape: f32[4,4], index: 3, kind: input, shape index: {}]   ;;  %s1252_s4 = inlined_call_operand.vmem [shape: f32[4,1], index: 4, kind: input, shape index: {}]   ;;  %s1253_s5 = inlined_call_operand.vmem [shape: f32[4,1], index: 5, kind: input, shape index: {}]   ;;  %s1254_s6 = inlined_call_operand.<no memory space> [shape: f32[1], index: 6, kind: input, shape index: {}]   ;;  %s1255_s7 = inlined_call_operand.hbm [shape: f32[2,4,256], index: 7, kind: output, shape index: {}]  }
   0x1   :  { %1258 = sst [smem:[#allocation12_spill]] %s1248_s0 }
   0x2   :  { %12 = sst [smem:[#allocation2]] %s1254_s6 }
   0x3   :  { %13 = vsyncpa [#allocation4], 0 }
   0x4   :  { %15 = vsyncpa [#allocation4 + $0x1], 0 }
   0x5   :  { %16 = vsyncpa [#allocation7], 0 }
   0x6   :  { %18 = vsyncpa [#allocation7 + $0x1], 0 }
   0x7   :  { %19 = vsyncpa [#allocation5], 0 }
   0x8   :  { %21 = vsyncpa [#allocation5 + $0x1], 0  ;;  %s1007_s26 = smov 0   ;;  %s1009_s27 = smov 0  }
   0x9   :  { %s1011_s28 = smov 0   ;;  %s1013_s29 = smov 0  }
   0xa   :  { %s1015_s30 = smov 0   ;;  %s1017_s8 = smov 0  }
   0xb LB: > { %s702_s6 = sadd.s32 4294967295, %s957_s8   ;;  %s703_s9 = sadd.s32 4294967294, %s957_s8   ;;  %s957_s8 = sphi %s1017_s8, %s27_s8   ;;  %s953_s30 = sphi %s1015_s30, %s1277_s30   ;;  %s949_s29 = sphi %s1013_s29, %s1276_s29   ;;  %s945_s28 = sphi %s1011_s28, %s1275_s28   ;;  %s941_s27 = sphi %s1009_s27, %s1274_s27   ;;  %s937_s26 = sphi %s1007_s26, %s1273_s26  }
   0xc   : > { %s39_s10 = sadd.s32 1, %s953_s30  ;;  %s48_s11 = sadd.s32 1, %s945_s28 }
   0xd   : > { %p41_p0 = scmp.ge.s32.totalorder %s39_s10, 2  ;;  %p55_p1 = scmp.ne.s32.totalorder %s945_s28, %s941_s27 }
   0xe   : > { %p56_p2 = scmp.eq.s32.totalorder %s957_s8, 0  ;;  %p61_p3 = scmp.ne.s32.totalorder %s941_s27, %s937_s26 }
   0xf   : > { %s1279_s10 = smov (%p41_p0, %s39_s10), 0  ;;  %p62_p5 = scmp.eq.s32.totalorder %s702_s6, 0 }
  0x10   : > { %p1048_p4 = por %p56_p2, %p55_p1  ;;  %s43_s13 = ssub.s32 %s953_s30, %s1279_s10 }
  0x11   : > { %p220_p6 = scmp.eq.s32.totalorder %s702_s6, 1  ;;  %p46_p7 = scmp.eq.s32.totalorder %s43_s13, 0 }
  0x12   : > { %p1054_p8 = por %p62_p5, %p61_p3  ;;  %p226_p10 = scmp.eq.s32.totalorder %s703_s9, 1 }
  0x13   : > { %p1058_p9 = por %p220_p6, %p55_p1  ;;  %p749_p13 = scmp.lt.s32.totalorder %s957_s8, 2 }
  0x14   : > { %s1260_s14 = scalar_select %p1054_p8, 1, 0 }
  0x15   : > { %s1261_s15 = scalar_select %p1058_p9, 1, 0 }
  0x16   : > { %s1063_s16 = scalar_select %p46_p7, %s945_s28, %s48_s11  }
  0x17   : > { %p1065_p11 = por %p226_p10, %p61_p3  ;;  %s1072_s18 = sand.u32 1, %s945_s28  }
  0x18   : > { %s706_s19 = sshll.u32 %s1072_s18, 3  ;;  %s727_s20 = sshll.u32 %s953_s30, 7 }
  0x19   : > { %s1262_s17 = scalar_select %p1065_p11, 1, 0 }
  0x1a   : > { %s1263_s0 = sld [smem:[#allocation12_spill]]  ;;  %s265_s24 = scalar_lea.vmem [#allocation3], %s706_s19 }
  0x1b   : > { %s275_s25 = sshll.u32 %s265_s24, 4  ;;  %p1085_p0 = pnand %p749_p13, %p1048_p4  ;;  %s1081_s25 = int_to_ptr.vmem [resolvable:$true] %s275_s25 }
  0x1c   : > { %s262_s9 = scalar_lea.sflag [#allocation4], %s1072_s18 }
  0x1d   : > { %p813_p5 = pneg %p1085_p0 }
  0x20   : > { %s1079_s23 = scalar_lea.hbm %s1263_s0, %s727_s20  ;;  %s816_s12 = scalar_lea.hbm %s1263_s0, 256 }
  0x21   : > { %s811_s11 = scalar_lea.hbm %s1079_s23, 128  ;;  %p817_p4 = scmp.lt.u32.totalorder %s1079_s23, %s1263_s0 }
  0x22   : > { %p812_p3 = scmp.ne.s32.totalorder %s1079_s23, %s811_s11  ;;  %p818_p10 = scmp.lt.u32.totalorder %s816_s12, %s811_s11 }
  0x23   : > { %p820_p12 = scmp.lt.u32.totalorder %s811_s11, %s1079_s23 }
  0x24   : > { %p814_p6 = pnand %p813_p5, %p812_p3  ;;  %p819_p13 = por %p818_p10, %p817_p4 }
  0x26   : > { %p815_p7 = pneg %p814_p6  ;;  %p821_p1 = por %p820_p12, %p819_p13 }
  0x28   : > { %p822_p2 = pnand %p821_p1, %p815_p7 }
  0x2a   : > { %825 = shalt.err (!%p822_p2)
}
  0x2b   : > { %s826_s22 = scalar_lea.vmem %s1081_s25, 128  ;;  %s959_s24 = smov [#allocation3]  }
  0x2c   : > { %p827_p3 = scmp.ne.s32.totalorder %s1081_s25, %s826_s22  ;;  %s831_s13 = sshll.u32 %s959_s24, 4  ;;  %s832_s13 = int_to_ptr.vmem [resolvable:$false] %s831_s13 }
  0x2d   : > { %s833_s19 = scalar_lea.vmem %s832_s13, 256  ;;  %p834_p9 = scmp.lt.s32.totalorder %s1081_s25, %s832_s13 }
  0x2e   : > { %p829_p6 = pnand %p827_p3, %p813_p5  ;;  %p835_p4 = scmp.lt.s32.totalorder %s833_s19, %s826_s22 }
  0x30   : > { %p830_p11 = pneg %p829_p6  ;;  %p836_p10 = por %p835_p4, %p834_p9 }
  0x32   : > { %p837_p12 = pnand %p836_p10, %p830_p11 }
  0x34   : > { %840 = shalt.err (!%p837_p12)
}
  0x35   : > { %741 = dma.hbm_to_vmem [thread:$0]  (!%p1085_p0), %s1079_s23, 128, %s1081_s25, %s262_s9  }
  0x36   : > { %p1265_p1 = scmp.lt.s32.totalorder %s957_s8, 3  ;;  %p1266_p2 = scmp.ge.s32.totalorder %s957_s8, 1 }
  0x37   : > { %s709_s12 = sshll.u32 %s1072_s18, 4  ;;  %s728_s20 = sshll.u32 %s953_s30, 8 }
  0x38   : > { %p1121_p7 = pnand %p1266_p2, %p1265_p1  ;;  %s1130_s24 = scalar_lea.hbm %s1249_s1, %s728_s20 }
  0x39   : > { %s286_s13 = scalar_lea.vmem [#allocation6], %s709_s12  ;;  %s283_s23 = scalar_lea.sflag [#allocation7], %s1072_s18 }
  0x3a   : > { %s1267_s11 = scalar_select %p1121_p7, 1, 0 }
  0x3b   : > { %s296_s19 = sshll.u32 %s286_s13, 4  ;;  %s841_s25 = scalar_lea.hbm %s1130_s24, 256  ;;  %s297_s19 = int_to_ptr.vmem [resolvable:$true] %s296_s19 }
  0x3c   : > { %p842_p9 = scmp.ne.s32.totalorder %s1130_s24, %s841_s25  ;;  %s846_s21 = scalar_lea.hbm %s1249_s1, 512 }
  0x3d   : > { %p847_p3 = scmp.lt.u32.totalorder %s1130_s24, %s1249_s1  ;;  %p848_p6 = scmp.lt.u32.totalorder %s846_s21, %s841_s25 }
  0x3e   : > { %p844_p11 = pnand %p842_p9, %p813_p5  ;;  %p850_p10 = scmp.lt.u32.totalorder %s841_s25, %s1130_s24 }
  0x3f   : > { %p849_p4 = por %p848_p6, %p847_p3 }
  0x40   : > { %p845_p13 = pneg %p844_p11 }
  0x41   : > { %p851_p12 = por %p850_p10, %p849_p4 }
  0x43   : > { %p852_p1 = pnand %p851_p12, %p845_p13 }
  0x45   : > { %855 = shalt.err (!%p852_p1)
}
  0x46   : > { %s856_s18 = scalar_lea.vmem %s297_s19, 256  ;;  %s960_s12 = smov [#allocation6]  }
  0x47   : > { %p857_p2 = scmp.ne.s32.totalorder %s297_s19, %s856_s18  ;;  %s861_s0 = sshll.u32 %s960_s12, 4  ;;  %s862_s0 = int_to_ptr.vmem [resolvable:$false] %s861_s0 }
  0x48   : > { %s863_s13 = scalar_lea.vmem %s862_s0, 512  ;;  %p864_p8 = scmp.lt.s32.totalorder %s297_s19, %s862_s0 }
  0x49   : > { %p859_p9 = pnand %p857_p2, %p813_p5  ;;  %p865_p7 = scmp.lt.s32.totalorder %s863_s13, %s856_s18 }
  0x4b   : > { %p860_p11 = pneg %p859_p9  ;;  %p866_p3 = por %p865_p7, %p864_p8 }
  0x4d   : > { %p867_p6 = pnand %p866_p3, %p860_p11 }
  0x4f   : > { %870 = shalt.err (!%p867_p6)
}
  0x50   : > { %744 = dma.hbm_to_vmem [thread:$0]  (!%p1085_p0), %s1130_s24, 256, %s297_s19, %s283_s23  }
  0x51   : > { %p1268_p13 = scmp.ne.s32.totalorder %s1267_s11, 0 }
  0x52   : > { %s1155_s25 = sand.u32 (!%p1268_p13), 1, %s941_s27   ;;  %p1269_p8 = scmp.ne.s32.totalorder (!%p1268_p13), %s1260_s14, 0 }
  0x53   : > { %305 = sbr.rel (%p1268_p13) target bundleno = 380 (0x17c), region = 48  ;;  %s713_s9 = sshll.u32 (!%p1268_p13), %s1155_s25, 3 }
  0x54   : > { %s308_s21 = scalar_lea.sflag (!%p1268_p13), [#allocation4], %s1155_s25  ;;  %s311_s20 = scalar_lea.vmem (!%p1268_p13), [#allocation3], %s713_s9 }
  0x5a   : > { %924 = dma.done.wait (%p1269_p8), %s308_s21, 128  }
  0x5b   : > { %926 = vsyncadd (%p1269_p8), %s308_s21, 4294967168  ;;  %s714_s6 = sshll.u32 %s1155_s25, 4  ;;  %s317_s11 = scalar_lea.sflag [#allocation7], %s1155_s25 }
  0x5c   : > { %s320_s24 = scalar_lea.vmem [#allocation6], %s714_s6 }
  0x5d   : > { %928 = dma.done.wait (%p1269_p8), %s317_s11, 256  }
  0x5e   : > { %930 = vsyncadd (%p1269_p8), %s317_s11, 4294967040  ;;  %v961_v0 = vmov 0.0   ;;  %v962_v1 = vmov 0   ;;  %v361_v2 = vld [vmem:[%s320_s24 + $0x8] sm:$0xff]  ;;  %vm370_vm0 = vcmask 1043456   ;;  %v360_v4 = vld [vmem:[%s320_s24] sm:$0xff] }
  0x5f   : > { %514 = vmatprep.mubr.f32.mxu0 %v961_v0  ;;  %439 = vmatprep.mubr.f32.mxu1 %v961_v0  ;;  %v1171_v3 = vld [vmem:[%s311_s20] sm:$0xff]  ;;  %vm446_vm1 = vcmask 64512   ;;  %vm366_vm2 = vcmask 31744   ;;  %s553_s21 = sld [smem:[#allocation2]]  ;;  %s729_s20 = sshll.u32 %s949_s29, 7 }
  0x60   : > { %801 = vset.pattern.permute.xlu0 %v962_v1  ;;  %450 = vmatprep.subr.mxu0 %v361_v2  ;;  %v365_v5 = vcombine.high %v1171_v3, %v1171_v3  ;;  %v362_v6 = vld [vmem:[%s1250_s2] sm:$0xf]  ;;  %s355_s6 = scalar_lea.vmem [#allocation8], %s713_s9  ;;  %s1199_s23 = scalar_lea.hbm %s1255_s7, %s729_s20 }
  0x61   : > { %v521_v7 = vld [vmem:[%s1252_s4] sm:$0xf]  ;;  %451 = vmatpush1.msra.mxu0 %v360_v4  ;;  %s592_s11 = sshll.u32 %s355_s6, 4  ;;  %s576_s14 = scalar_lea.sflag [#allocation5], %s1155_s25  ;;  %s1201_s11 = int_to_ptr.vmem [resolvable:$true] %s592_s11 }
  0x62   : > { %v363_v8 = vld [vmem:[%s1251_s3] sm:$0xf]  ;;  %524 = vperm.xlu0 %801, %v521_v7   ;;  %716 = vmatprep.subr.msk.mxu1 %vm370_vm0, %v365_v5  ;;  %s871_s22 = scalar_lea.vmem %s1201_s11, 128  ;;  %p1270_p5 = scmp.ne.s32.totalorder %s1261_s15, 0 }
  0x63   : > { %719 = vmatmul.mubr.msk.f32.vlgmr.msra.gmra.mrb[0].mxu0 %vm446_vm1, %v362_v6  ;;  %v531_v9 = vld [vmem:[%s1253_s5] sm:$0xf]  ;;  %717 = vmatpush1.msk.msra.mxu1 %vm370_vm0, %v1171_v3  ;;  %p872_p0 = scmp.ne.s32.totalorder %s1201_s11, %s871_s22  ;;  %s963_s29 = smov [#allocation8]  }
  0x64   : > { %718 = vmatmul.mubr.msk.f32.vlgmr.msra.gmra.mrb[0].mxu1 %vm366_vm2, %v363_v8  ;;  %s875_s9 = sshll.u32 %s963_s29, 4  ;;  %s876_s9 = int_to_ptr.vmem [resolvable:$false] %s875_s9 }
  0x65   : > { %v554_v35 = vstv %s553_s21  ;;  %p873_p7 = pnand %p872_p0, %p1270_p5  ;;  %s877_s18 = scalar_lea.vmem %s876_s9, 256 }
  0x66   : > { %534 = vperm.xlu0 %801, %v531_v9   ;;  %p878_p10 = scmp.lt.s32.totalorder %s1201_s11, %s876_s9  ;;  %p879_p12 = scmp.lt.s32.totalorder %s877_s18, %s871_s22 }
  0x67   : > { %p874_p4 = pneg %p873_p7 }
  0x68   : > { %p880_p1 = por %p879_p12, %p878_p10 }
  0x6a   : > { %p881_p2 = pnand %p880_p1, %p874_p4 }
  0xe1   : > { %v525_v12 = vpop.permute.xlu0 %524 }
  0xe5   : > { %v535_v20 = vpop.permute.xlu0 %534 }
 0x136   : > { %v516_v10 = vpop.f32.mrb[0].mxu0 }
 0x137   : > { %v518_v11 = vpop.f32.mrb[1].mxu0  ;;  %v441_v13 = vpop.f32.mrb[0].mxu1 }
 0x138   : > { %v517_v14 = vadd.f32 %v516_v10, %v441_v13  ;;  %v443_v15 = vpop.f32.mrb[1].mxu1 }
 0x139   : > { %v519_v16 = vadd.f32 %v518_v11, %v443_v15 }
 0x13a   : > { %v527_v17 = vadd.f32 %v525_v12, %v517_v14 }
 0x13b   : > { %v528_v18 = vadd.f32 %v525_v12, %v519_v16 }
 0x13c   : > { %v529_v19 = vmax.f32 %v527_v17, 0.0 }
 0x13d   : > { %v530_v21 = vmax.f32 %v528_v18, 0.0 }
 0x13e   : > { %v537_v22 = vmul.f32 %v535_v20, %v529_v19 }
 0x13f   : > { %v538_v23 = vmul.f32 %v535_v20, %v530_v21 }
 0x140   : > { %v539_v24 = vsel %vm370_vm0, %v537_v22, 0.0 }
 0x141   : > { %v540_v25 = vrot.slane %v539_v24, 4  ;;  %v546_v26 = vsel %vm370_vm0, %v538_v23, 0.0 }
 0x142   : > { %v547_v27 = vrot.slane %v546_v26, 4 }
 0x143   : > { %v541_v28 = vadd.f32 %v540_v25, %v539_v24 }
 0x144   : > { %v548_v29 = vadd.f32 %v547_v27, %v546_v26 }
 0x145   : > { %v542_v30 = vrot.slane %v541_v28, 2 }
 0x146   : > { %v549_v31 = vrot.slane %v548_v29, 2 }
 0x147   : > { %v543_v32 = vadd.f32 %v542_v30, %v541_v28 }
 0x148   : > { %v550_v33 = vadd.f32 %v549_v31, %v548_v29 }
 0x149   : > { %v544_v34 = vrot.slane %v543_v32, 1 }
 0x14a   : > { %v551_v36 = vrot.slane %v550_v33, 1 }
 0x14b   : > { %v545_v37 = vadd.f32 %v544_v34, %v543_v32 }
 0x14c   : > { %v552_v38 = vadd.f32 %v551_v36, %v550_v33 }
 0x14d   : > { %v555_v39 = vadd.f32 %v554_v35, %v545_v37 }
 0x14e   : > { %v556_v40 = vadd.f32 %v554_v35, %v552_v38 }
 0x14f   : > { %v720_v41 = vmul.f32 -1.442695, %v555_v39 }
 0x150   : > { %v721_v42 = vmul.f32 -1.442695, %v556_v40 }
 0x151   : > { %803 = vpow2.f32 %v720_v41 }
 0x152   : > { %805 = vpow2.f32 %v721_v42 }
 0x15b   : > { %v804_v43 = vpop.eup %803 }
 0x15c   : > { %v806_v44 = vpop.eup %805  ;;  %v563_v45 = vadd.f32 1.0, %v804_v43 }
 0x15d   : > { %v564_v46 = vadd.f32 1.0, %v806_v44 }
 0x15e   : > { %807 = vrcp.f32 %v563_v45 }
 0x15f   : > { %809 = vrcp.f32 %v564_v46 }
 0x168   : > { %v808_v47 = vpop.eup %807 }
 0x169   : > { %v810_v48 = vpop.eup %809 }
 0x16a   : > { %v571_v49 = vcombine.low %v808_v47, %v810_v48 }
 0x16c   : > { %v573_v50 = vmul.f32 %v571_v49, %v1171_v3 }
 0x16e   : > { %574 = vst [vmem:[%s355_s6] sm:$0xff] %v573_v50 }
 0x16f   : > { %884 = shalt.err (!%p881_p2)
}
 0x170   : > { %s885_s25 = scalar_lea.hbm %s1199_s23, 128  ;;  %s889_s13 = scalar_lea.hbm %s1255_s7, 256 }
 0x171   : > { %p886_p9 = scmp.ne.s32.totalorder %s1199_s23, %s885_s25  ;;  %p890_p6 = scmp.lt.u32.totalorder %s1199_s23, %s1255_s7 }
 0x172   : > { %p891_p13 = scmp.lt.u32.totalorder %s889_s13, %s885_s25  ;;  %p893_p0 = scmp.lt.u32.totalorder %s885_s25, %s1199_s23 }
 0x173   : > { %p887_p11 = pnand %p886_p9, %p1270_p5 }
 0x174   : > { %p892_p8 = por %p891_p13, %p890_p6 }
 0x175   : > { %p888_p3 = pneg %p887_p11 }
 0x176   : > { %p894_p7 = por %p893_p0, %p892_p8 }
 0x178   : > { %p895_p4 = pnand %p894_p7, %p888_p3 }
 0x17a   : > { %898 = shalt.err (!%p895_p4)
}
 0x17b   : > { %736 = dma.vmem_to_hbm [thread:$0]  (%p1270_p5), %s1201_s11, 128, %s1199_s23, %s576_s14  }
 0x17c PF: > { %s604_s6 = sand.u32 1, %s937_s26   ;;  %p1271_p10 = scmp.ne.s32.totalorder %s1262_s17, 0 }
 0x17d   : > { %p1272_p12 = scmp.ge.s32.totalorder %s957_s8, 2  ;;  %s605_s24 = scalar_lea.sflag [#allocation5], %s604_s6 }
 0x17f   : > { %p746_p1 = pnand %p1272_p12, %p1271_p10 }
 0x181   : > { %932 = dma.done.wait (!%p746_p1), %s605_s24, 128  }
 0x182   : > { %934 = vsyncadd (!%p746_p1), %s605_s24, 4294967168  ;;  %s27_s8 = sadd.s32 1, %s957_s8   ;;  %s1273_s26 = smov %s941_s27 }
 0x183   : > { %p24_p2 = scmp.ge.s32.totalorder %s27_s8, 4   ;;  %s1274_s27 = smov %s945_s28 }
 0x184   : > { %s1275_s28 = smov %s1063_s16  ;;  %s1276_s29 = smov %s953_s30 }
 0x185   : > { %s1277_s30 = smov %s1279_s10  ;;  %26 = sbr.rel (!%p24_p2) target bundleno = 11 (0xb), region = 106 }
 0x18c   :  { %610 = vsyncpa [#allocation4], 1 }
 0x18d   :  { %612 = vsyncpa [#allocation4 + $0x1], 1 }
 0x18e   :  { %613 = vsyncpa [#allocation7], 1 }
 0x18f   :  { %615 = vsyncpa [#allocation7 + $0x1], 1 }
 0x190   :  { %616 = vsyncpa [#allocation5], 1 }
 0x191   :  { %618 = vsyncpa [#allocation5 + $0x1], 1 }

</bundles_post_ra>
